<compile_context>
chip_gen: v5e
topology: v5e:2x2
jax: 0.10.0
libtpu: 0.0.40
codegen_flags: <defaults>
</compile_context>

<pallas_src>
import jax
import jax.numpy as jnp
from jax.experimental import pallas as pl
from jax.experimental.pallas import tpu as pltpu


def se_kernel(x_ref, w1_ref, w2_ref, o_ref):
    # x_ref / o_ref: (TB, C, H*W) block in the activation's native dtype.
    x = x_ref[...]                                                     # (TB, C, HW)
    inv_hw = 1.0 / x.shape[-1]

    # --- squeeze: global average pool == one lane-axis reduction (f32 accumulate) ---
    pooled = jnp.sum(x, axis=-1, dtype=jnp.float32) * inv_hw           # (TB, C) f32

    # --- excite: Linear(C->hidden, no bias) + ReLU ---
    h = jnp.dot(pooled, w1_ref[...].astype(jnp.float32),
                preferred_element_type=jnp.float32)                    # (TB, hidden)
    h = jnp.maximum(h, 0.0)

    # --- Linear(hidden->C, no bias) + Sigmoid ---
    y = jnp.dot(h, w2_ref[...].astype(jnp.float32),
                preferred_element_type=jnp.float32)                    # (TB, C)
    y = jax.nn.sigmoid(y)

    # --- rescale: per-channel scale broadcast over the lane-dense spatial axis ---
    scale = y.astype(x.dtype)[:, :, None]                              # (TB, C, 1)
    o_ref[...] = x * scale


def _pick_tb(batch, per_sample_bytes, weight_bytes, *, max_tb=8, vmem_budget=24 << 20):
    """Largest divisor of `batch` that (a) keeps >= 2 grid steps when batch >= 2
    (so both v7x TensorCores get work) and (b) keeps the pipelined blocks
    (3 input buffers + 2 output buffers + resident weights) within the VMEM budget."""
    cap = max_tb if batch < 2 else min(max_tb, max(1, batch // 2))
    best = 1
    for tb in range(1, min(cap, batch) + 1):
        if batch % tb != 0:
            continue
        if 5 * tb * per_sample_bytes + weight_bytes <= vmem_budget:
            best = tb
    return best


def se_forward(x, w1, w2):
    """x: (B, C, H, W); w1: (C, hidden); w2: (hidden, C). Returns (B, C, H, W)."""
    B, C, H, W = x.shape
    hidden = w1.shape[1]
    assert w1.shape == (C, hidden) and w2.shape == (hidden, C)

    HW = H * W
    # Lane-dense view of the activations (free-ish reshape on contiguous NCHW).
    x3 = x.reshape(B, C, HW)

    itemsize = jnp.dtype(x.dtype).itemsize
    per_sample_bytes = C * HW * itemsize
    weight_bytes = (w1.size * jnp.dtype(w1.dtype).itemsize
                    + w2.size * jnp.dtype(w2.dtype).itemsize)
    TB = _pick_tb(B, per_sample_bytes, weight_bytes)
    grid_b = B // TB

    # Deeper input buffering only pays once there are enough grid steps to fill it.
    if grid_b >= 3:
        x_spec = pl.BlockSpec((TB, C, HW), lambda b: (b, 0, 0),
                              pipeline_mode=pl.Buffered(3))
    else:
        x_spec = pl.BlockSpec((TB, C, HW), lambda b: (b, 0, 0))

    out3 = pl.pallas_call(
        se_kernel,
        out_shape=jax.ShapeDtypeStruct((B, C, HW), x.dtype),
        grid_spec=pltpu.PrefetchScalarGridSpec(
            num_scalar_prefetch=0,
            grid=(grid_b,),
            in_specs=[
                x_spec,
                pl.BlockSpec((C, hidden), lambda b: (0, 0)),   # resident across grid
                pl.BlockSpec((hidden, C), lambda b: (0, 0)),   # resident across grid
            ],
            out_specs=pl.BlockSpec((TB, C, HW), lambda b: (b, 0, 0)),
        ),
        compiler_params=pltpu.CompilerParams(
            dimension_semantics=("parallel",),
            vmem_limit_bytes=32 * 1024 * 1024,  # explicit budget; safe on all generations
        ),
    )(x3, w1, w2)

    return out3.reshape(B, C, H, W)


def se_reference(x, w1, w2):
    """Pure-JAX reference mirroring the PyTorch SE.forward."""
    pooled = jnp.mean(x, axis=(2, 3))                  # (B, C)
    h = jnp.maximum(pooled @ w1, 0.0)                  # (B, hidden)
    y = jax.nn.sigmoid(h @ w2)                         # (B, C)
    return x * y[:, :, None, None]


if __name__ == "__main__":
    # Module config: SE(inp=16, oup=16, expansion=0.25) -> hidden = 4
    B, C, H, W = 2, 16, 16, 16
    hidden = int(C * 0.25)

    key = jax.random.PRNGKey(0)
    kx, k1, k2 = jax.random.split(key, 3)
    x = jax.random.normal(kx, (B, C, H, W), dtype=jnp.float32)
    # Deterministic weight init (nn.Linear-like scale), bias=False in the module.
    w1 = jax.random.normal(k1, (C, hidden), dtype=jnp.float32) * (1.0 / jnp.sqrt(C))
    w2 = jax.random.normal(k2, (hidden, C), dtype=jnp.float32) * (1.0 / jnp.sqrt(hidden))

    out = se_forward(x, w1, w2)
    out = jax.block_until_ready(out)

    ref = se_reference(x, w1, w2)
    assert out.shape == (B, C, H, W)
    assert jnp.allclose(out, ref, atol=1e-5, rtol=1e-5), "mismatch vs JAX reference"

    print("KERNEL_OK")
</pallas_src>

<mosaic_0001>
module attributes {stable_mosaic.version = 11 : i64} {
  func.func @se_kernel(%arg0: i32, %arg1: memref<1x16x256xf32, #tpu.memory_space<vmem>>, %arg2: memref<16x4xf32, #tpu.memory_space<vmem>>, %arg3: memref<4x16xf32, #tpu.memory_space<vmem>>, %arg4: memref<1x16x256xf32, #tpu.memory_space<vmem>>) attributes {dimension_semantics = [#tpu.dimension_semantics<parallel>], iteration_bounds = array<i64: 2>, scalar_prefetch = 0 : i64, scratch_operands = 0 : i64, tpu.core_type = #tpu.core_type<tc>, window_params = [{transform_indices = @transform_0, window_bounds = array<i64: 1, 16, 256>}, {pipeline_mode = #tpu.pipeline_mode<synchronous>, transform_indices = @transform_1, window_bounds = array<i64: 16, 4>}, {pipeline_mode = #tpu.pipeline_mode<synchronous>, transform_indices = @transform_2, window_bounds = array<i64: 4, 16>}, {transform_indices = @transform_3, window_bounds = array<i64: 1, 16, 256>}]} {
    %c0 = arith.constant 0 : index
    %c0_0 = arith.constant 0 : index
    %c0_1 = arith.constant 0 : index
    %0 = vector.load %arg1[%c0, %c0_0, %c0_1] : memref<1x16x256xf32, #tpu.memory_space<vmem>>, vector<1x16x256xf32>
    %cst = arith.constant dense<0.000000e+00> : vector<1x16xf32>
    %1 = vector.multi_reduction <add>, %0, %cst [2] : vector<1x16x256xf32> to vector<1x16xf32>
    %cst_2 = arith.constant 3.906250e-03 : f32
    %2 = vector.broadcast %cst_2 : f32 to vector<1x16xf32>
    %3 = arith.mulf %1, %2 : vector<1x16xf32>
    %c0_3 = arith.constant 0 : index
    %c0_4 = arith.constant 0 : index
    %4 = vector.load %arg2[%c0_3, %c0_4] : memref<16x4xf32, #tpu.memory_space<vmem>>, vector<16x4xf32>
    %cst_5 = arith.constant dense<0.000000e+00> : vector<1x4xf32>
    %5 = tpu.matmul %3, %4, %cst_5 {dimension_numbers = #tpu.dot_dimension_numbers<[1], [0], [0], [1], [0, 0, 1, 1], [], []>} : vector<1x16xf32>, vector<16x4xf32>, vector<1x4xf32> -> vector<1x4xf32>
    %cst_6 = arith.constant 0.000000e+00 : f32
    %6 = vector.broadcast %cst_6 : f32 to vector<1x4xf32>
    %7 = arith.maximumf %5, %6 : vector<1x4xf32>
    %c0_7 = arith.constant 0 : index
    %c0_8 = arith.constant 0 : index
    %8 = vector.load %arg3[%c0_7, %c0_8] : memref<4x16xf32, #tpu.memory_space<vmem>>, vector<4x16xf32>
    %cst_9 = arith.constant dense<0.000000e+00> : vector<1x16xf32>
    %9 = tpu.matmul %7, %8, %cst_9 {dimension_numbers = #tpu.dot_dimension_numbers<[1], [0], [0], [1], [0, 0, 1, 1], [], []>} : vector<1x4xf32>, vector<4x16xf32>, vector<1x16xf32> -> vector<1x16xf32>
    %10 = arith.negf %9 : vector<1x16xf32>
    %11 = math.exp %10 : vector<1x16xf32>
    %cst_10 = arith.constant 1.000000e+00 : f32
    %12 = vector.broadcast %cst_10 : f32 to vector<1x16xf32>
    %13 = arith.addf %12, %11 : vector<1x16xf32>
    %14 = arith.divf %12, %13 : vector<1x16xf32>
    %15 = vector.shape_cast %14 : vector<1x16xf32> to vector<1x16x1xf32>
    %16 = vector.broadcast %15 : vector<1x16x1xf32> to vector<1x16x256xf32>
    %17 = arith.mulf %0, %16 : vector<1x16x256xf32>
    %c0_11 = arith.constant 0 : index
    %c0_12 = arith.constant 0 : index
    %c0_13 = arith.constant 0 : index
    %18 = vector.load %arg4[%c0_11, %c0_12, %c0_13] : memref<1x16x256xf32, #tpu.memory_space<vmem>>, vector<1x16x256xf32>
    tpu.vector_store %arg4[%c0_11, %c0_12, %c0_13], %17 {strides = array<i32>} : memref<1x16x256xf32, #tpu.memory_space<vmem>>, vector<1x16x256xf32>,
    return
  }
  func.func @transform_0(%arg0: i32) -> (i32, i32, i32) {
    %c0_i32 = arith.constant 0 : i32
    %c0_i32_0 = arith.constant 0 : i32
    %c0_i32_1 = arith.constant 0 : i32
    return %arg0, %c0_i32, %c0_i32_0 : i32, i32, i32
  }
  func.func @transform_1(%arg0: i32) -> (i32, i32) {
    %c0_i32 = arith.constant 0 : i32
    %c0_i32_0 = arith.constant 0 : i32
    %c0_i32_1 = arith.constant 0 : i32
    return %c0_i32, %c0_i32_0 : i32, i32
  }
  func.func @transform_2(%arg0: i32) -> (i32, i32) {
    %c0_i32 = arith.constant 0 : i32
    %c0_i32_0 = arith.constant 0 : i32
    %c0_i32_1 = arith.constant 0 : i32
    return %c0_i32, %c0_i32_0 : i32, i32
  }
  func.func @transform_3(%arg0: i32) -> (i32, i32, i32) {
    %c0_i32 = arith.constant 0 : i32
    %c0_i32_0 = arith.constant 0 : i32
    %c0_i32_1 = arith.constant 0 : i32
    return %arg0, %c0_i32, %c0_i32_0 : i32, i32, i32
  }
}

</mosaic_0001>

<bundles_post_ra>
// kernel: tpu_custom_call.1
= control target key start
LH: loop header
LB: loop body
LE: loop exit
PB: predicated region body
PF: predicated region fallthrough
CT: control target
= control target key end

     0   :  { %8 = vsyncpa [#allocation3], 0  ;;  %s743_s0 = inlined_call_operand.hbm [shape: f32[2,16,256], index: 0, kind: input, shape index: {}]   ;;  %s744_s1 = inlined_call_operand.vmem [shape: f32[16,4], index: 1, kind: input, shape index: {}]   ;;  %s745_s2 = inlined_call_operand.vmem [shape: f32[4,16], index: 2, kind: input, shape index: {}]   ;;  %s746_s3 = inlined_call_operand.hbm [shape: f32[2,16,256], index: 3, kind: output, shape index: {}]  }
   0x1   :  { %10 = vsyncpa [#allocation3 + $0x1], 0 }
   0x2   :  { %11 = vsyncpa [#allocation4], 0 }
   0x3   :  { %13 = vsyncpa [#allocation4 + $0x1], 0  ;;  %s595_s12 = smov 0   ;;  %s597_s13 = smov 0  }
   0x4   :  { %s599_s14 = smov 0   ;;  %s601_s15 = smov 0  }
   0x5 LB: > { %s616_s16 = sadd.s32 4294967295, %s569_s15   ;;  %s396_s17 = sadd.s32 4294967294, %s569_s15   ;;  %s569_s15 = sphi %s601_s15, %s756_s15   ;;  %s565_s14 = sphi %s599_s14, %s755_s14   ;;  %s561_s13 = sphi %s597_s13, %s754_s13   ;;  %s557_s12 = sphi %s595_s12, %s753_s12  }
   0x6   : > { %s620_s18 = sadd.s32 1, %s569_s15   ;;  %s26_s19 = sadd.s32 1, %s565_s14 }
   0x7   : > { %s23_s20 = ssub.s32 %s569_s15, %s620_s18  ;;  %p33_p0 = scmp.ne.s32.totalorder %s565_s14, %s561_s13 }
   0x8   : > { %p24_p1 = scmp.eq.s32.totalorder %s23_s20, 0  ;;  %p34_p2 = scmp.eq.s32.totalorder %s569_s15, 0 }
   0x9   : > { %p39_p3 = scmp.ne.s32.totalorder %s561_s13, %s557_s12  ;;  %p40_p4 = scmp.eq.s32.totalorder %s616_s16, 0 }
   0xa   : > { %s632_s21 = scalar_select %p24_p1, %s565_s14, %s26_s19  }
   0xb   : > { %p634_p5 = por %p34_p2, %p33_p0  ;;  %p638_p6 = por %p40_p4, %p39_p3 }
   0xc   : > { %p105_p7 = scmp.eq.s32.totalorder %s616_s16, 1  ;;  %p111_p8 = scmp.eq.s32.totalorder %s396_s17, 1 }
   0xd   : > { %p428_p10 = scmp.lt.s32.totalorder %s569_s15, 2  ;;  %s137_s26 = sand.u32 1, %s565_s14  }
   0xe   : > { %p645_p11 = por %p105_p7, %p33_p0  ;;  %p649_p12 = por %p111_p8, %p39_p3 }
   0xf   : > { %s414_s27 = sshll.u32 %s569_s15, 5  ;;  %s399_s28 = sshll.u32 %s137_s26, 5 }
  0x10   : > { %s146_s4 = scalar_lea.hbm %s743_s0, %s414_s27  ;;  %s141_s6 = scalar_lea.vmem [#allocation2], %s399_s28 }
  0x11   : > { %s147_s5 = sshll.u32 %s146_s4, 4  ;;  %s149_s7 = sshll.u32 %s141_s6, 4  ;;  %s148_s5 = int_to_ptr.hbm [resolvable:$true] %s147_s5  ;;  %s150_s7 = int_to_ptr.vmem [resolvable:$true] %s149_s7 }
  0x12   : > { %p660_p13 = pnand %p428_p10, %p634_p5  ;;  %p402_p0 = scmp.ge.s32.totalorder %s569_s15, 1 }
  0x13   : > { %p157_p1 = scmp.lt.s32.totalorder %s569_s15, 3  ;;  %s138_s9 = scalar_lea.sflag [#allocation3], %s137_s26 }
  0x14   : > { %s473_s10 = sshra.s32 %s148_s5, 4  ;;  %p477_p3 = pneg %p660_p13  ;;  %s474_s10 = int_to_ptr.hbm [resolvable:$true] %s473_s10 }
  0x15   : > { %s475_s11 = scalar_lea.hbm %s474_s10, 32  ;;  %s480_s20 = scalar_lea.hbm %s743_s0, 64 }
  0x16   : > { %p476_p2 = scmp.ne.s32.totalorder %s474_s10, %s475_s11  ;;  %p481_p5 = scmp.lt.s32.totalorder %s474_s10, %s743_s0 }
  0x17   : > { %p482_p8 = scmp.lt.s32.totalorder %s480_s20, %s475_s11 }
  0x18   : > { %p478_p4 = pnand %p477_p3, %p476_p2 }
  0x19   : > { %p483_p10 = por %p482_p8, %p481_p5 }
  0x1a   : > { %p479_p7 = pneg %p478_p4 }
  0x1c   : > { %p484_p9 = pnand %p483_p10, %p479_p7 }
  0x1e   : > { %487 = shalt.err (!%p484_p9)
}
  0x1f   : > { %s571_s26 = smov 256   ;;  %s572_s28 = smov 16  }
  0x20   : > { %423 = dma.hbm_to_vmem [thread:$0]  (!%p660_p13), %s148_s5, 512, %s150_s7, %s138_s9, %s571_s26, %s571_s26, %s572_s28  }
  0x21   : > { %p158_p2 = pnand %p402_p0, %p157_p1 }
  0x22   : > { %s681_s29 = sand.u32 (!%p158_p2), 1, %s561_s13  }
  0x23   : > { %161 = sbr.rel (%p158_p2) target bundleno = 595 (0x253), region = 32  ;;  %s403_s30 = sshll.u32 (!%p158_p2), %s681_s29, 5 }
  0x24   : > { %s164_s4 = scalar_lea.sflag (!%p158_p2), [#allocation3], %s681_s29  ;;  %s167_s6 = scalar_lea.vmem (!%p158_p2), [#allocation2], %s403_s30 }
  0x28   : > { %548 = dma.done.wait (%p638_p6), %s164_s4, 512  }
  0x29   : > { %550 = vsyncadd (%p638_p6), %s164_s4, 4294966784  ;;  %v191_v0 = vld [vmem:[%s167_s6] sm:$0xff]  ;;  %v192_v1 = vld [vmem:[%s167_s6 + $0x8] sm:$0xff]  ;;  %v207_v9 = vlaneseq  ;;  %vm212_vm0 = vcmask 130112   ;;  %vm214_vm1 = vcmask 130048   ;;  %vm243_vm2 = vcmask 1043456  }
  0x2a   : > { %v195_v2 = vadd.f32 %v192_v1, %v191_v0  ;;  %v691_v3 = vld [vmem:[%s167_s6 + $0x10] sm:$0xff]  ;;  %v693_v4 = vld [vmem:[%s167_s6 + $0x18] sm:$0xff]  ;;  %v204_v6 = vld [vmem:[%s744_s1 + $0x8] sm:$0xff]  ;;  %vm239_vm3 = vcmask 31744   ;;  %s190_s11 = scalar_lea.vmem [#allocation5], %s403_s30  ;;  %s415_s17 = sshll.u32 %s616_s16, 5 }
  0x2b   : > { %v198_v5 = vadd.f32 %v693_v4, %v691_v3  ;;  %231 = vmatpush.msra.mxu0 %v204_v6  ;;  %v203_v7 = vld [vmem:[%s744_s1] sm:$0xff]  ;;  %v208_v10 = vand.u32 127, %v207_v9  ;;  %v288_v21 = vshrl.u32 %v207_v9, 7  ;;  %s319_s22 = scalar_lea.hbm %s746_s3, %s415_s17  ;;  %s320_s27 = sshll.u32 %s190_s11, 4  ;;  %s321_s27 = int_to_ptr.vmem [resolvable:$true] %s320_s27 }
  0x2c   : > { %196 = vadd.xlane.f32.xlu0 %v195_v2  ;;  %v238_v18 = vld [vmem:[%s745_s2] sm:$0xf]  ;;  %s322_s26 = sshll.u32 %s319_s22, 4  ;;  %s308_s28 = scalar_lea.sflag [#allocation4], %s681_s29  ;;  %s323_s26 = int_to_ptr.hbm [resolvable:$true] %s322_s26 }
  0x2d   : > { %232 = vmatpush.msra.mxu0 %v203_v7  ;;  %v210_v12 = vadd.s32 4294967288, %v208_v10  ;;  %406 = vmatpush.msk.msra.mxu1 %vm243_vm2, %v238_v18  ;;  %v295_v22 = vadd.s32 8, %v288_v21  ;;  %s517_s30 = sshra.s32 %s323_s26, 4  ;;  %s523_s5 = scalar_lea.hbm %s746_s3, 64  ;;  %s518_s30 = int_to_ptr.hbm [resolvable:$true] %s517_s30 }
  0x2e   : > { %466 = vset.pattern.permute.xlu1 %v288_v21  ;;  %s519_s16 = scalar_lea.hbm %s518_s30, 32  ;;  %p524_p0 = scmp.lt.s32.totalorder %s518_s30, %s746_s3 }
  0x2f   : > { %468 = vset.pattern.permute.xlu0 %v295_v22  ;;  %p520_p6 = scmp.ne.s32.totalorder %s518_s30, %s519_s16  ;;  %p525_p1 = scmp.lt.s32.totalorder %s523_s5, %s519_s16 }
  0x31   : > { %p521_p9 = pnand %p520_p6, %p645_p11  ;;  %p526_p3 = por %p525_p1, %p524_p0 }
  0x33   : > { %p522_p13 = pneg %p521_p9 }
  0x34   : > { %199 = vadd.xlane.f32.xlu0 %v198_v5 }
  0x35   : > { %p527_p4 = pnand %p526_p3, %p522_p13 }
  0x9f   : > { %v197_v8 = vpop.xlane.xlu0 %196 }
  0xa0   : > { %v201_v11 = vmul.f32 0.00390625, %v197_v8 }
  0xa2   : > { %v209_v15 = vperm.slane %v201_v11, %v208_v10 }
  0xa7   : > { %v200_v13 = vpop.xlane.xlu0 %199 }
  0xa8   : > { %v202_v14 = vmul.f32 0.00390625, %v200_v13 }
  0xaa   : > { %v211_v16 = vperm.slane %v202_v14, %v210_v12 }
  0xac   : > { %v213_v17 = vsel %vm212_vm0, %v211_v16, %v209_v15 }
  0xad   : > { %405 = vmatmul.msk.f32.vlgmr.msra.gmra.mxu0 %vm214_vm1, %v213_v17 }
 0x12a   : > { %v234_v19 = vpop.f32.mrf.mxu0 }
 0x12b   : > { %v237_v20 = vmax.f32 %v234_v19, 0.0 }
 0x12d   : > { %407 = vmatmul.msk.f32.vlgmr.msra.gmra.mxu1 %vm239_vm3, %v237_v20 }
 0x1aa   : > { %v264_v23 = vpop.f32.mrf.mxu1 }
 0x1ab   : > { %v408_v24 = vmul.f32 -1.442695, %v264_v23 }
 0x1ad   : > { %469 = vpow2.f32 %v408_v24 }
 0x1b3   : > { %v470_v25 = vpop.eup %469 }
 0x1b4   : > { %v270_v26 = vadd.f32 1.0, %v470_v25 }
 0x1b6   : > { %471 = vrcp.f32 %v270_v26  ;;  %v282_v30 = vand.u32 2147483648, %v270_v26  ;;  %v280_v32 = vand.u32 2147483647, %v270_v26  ;;  %vm276_vm5 = vweird.f32 %v270_v26 }
 0x1b8   : > { %v283_v34 = vor.u32 1.1754944e-38, %v282_v30  ;;  %vm281_vm7 = vcmp.eq.f32.partialorder %v280_v32, 8.507059e+37 }
 0x1bc   : > { %v472_v27 = vpop.eup %471 }
 0x1bd   : > { %v272_v28 = vmul.f32 %v472_v27, %v270_v26  ;;  %vm277_vm4 = vweird.f32 %v472_v27 }
 0x1be   : > { %vm278_vm6 = vmor %vm276_vm5, %vm277_vm4 }
 0x1bf   : > { %v273_v29 = vsub.f32 1.0, %v272_v28 }
 0x1c1   : > { %v274_v31 = vmul.f32 %v472_v27, %v273_v29 }
 0x1c3   : > { %v275_v33 = vadd.f32 %v472_v27, %v274_v31 }
 0x1c5   : > { %v279_v35 = vsel %vm278_vm6, %v472_v27, %v275_v33 }
 0x1c6   : > { %v284_v36 = vsel %vm281_vm7, %v283_v34, %v279_v35 }
 0x1c7   : > { %v286_v37 = vperm.slane %v284_v36, 0 }
 0x1c9   : > { %291 = vperm.xlu1 %466, %v286_v37  }
 0x1d1   : > { %467 = vset.pattern.permute.xlu1 %v295_v22 }
 0x1d9   : > { %297 = vperm.xlu1 %467, %v286_v37  }
 0x23b   : > { %v292_v38 = vpop.permute.xlu1 %291 }
 0x23c   : > { %v299_v39 = vmul.f32 %v292_v38, %v191_v0  ;;  %v300_v40 = vmul.f32 %v292_v38, %v192_v1 }
 0x23e   : > { %303 = vst [vmem:[%s190_s11] sm:$0xff] %v299_v39 }
 0x23f   : > { %304 = vst [vmem:[%s190_s11 + $0x8] sm:$0xff] %v300_v40 }
 0x24b   : > { %v298_v41 = vpop.permute.xlu1 %297 }
 0x24c   : > { %v301_v42 = vmul.f32 %v298_v41, %v691_v3  ;;  %v302_v43 = vmul.f32 %v298_v41, %v693_v4 }
 0x24e   : > { %305 = vst [vmem:[%s190_s11 + $0x10] sm:$0xff] %v301_v42 }
 0x24f   : > { %306 = vst [vmem:[%s190_s11 + $0x18] sm:$0xff] %v302_v43 }
 0x250   : > { %530 = shalt.err (!%p527_p4)
}
 0x251   : > { %s573_s29 = smov 256   ;;  %s574_s23 = smov 16  }
 0x252   : > { %418 = dma.vmem_to_hbm [thread:$0]  (%p645_p11), %s321_s27, 512, %s323_s26, %s308_s28, %s573_s29, %s573_s29, %s574_s23  }
 0x253 PF: > { %s337_s9 = sand.u32 1, %s557_s12   ;;  %p752_p7 = scmp.ge.s32.totalorder %s569_s15, 2 }
 0x254   : > { %s338_s10 = scalar_lea.sflag [#allocation4], %s337_s9 }
 0x255   : > { %p425_p5 = pnand %p752_p7, %p649_p12 }
 0x257   : > { %p426_p8 = pneg %p425_p5 }
 0x259   : > { %552 = dma.done.wait (%p426_p8), %s338_s10, 512  }
 0x25a   : > { %554 = vsyncadd (%p426_p8), %s338_s10, 4294966784  ;;  %p16_p10 = scmp.ge.s32.totalorder %s620_s18, 4   ;;  %s753_s12 = smov %s561_s13 }
 0x25b   : > { %s754_s13 = smov %s565_s14  ;;  %s755_s14 = smov %s632_s21 }
 0x25c   : > { %s756_s15 = smov %s620_s18  ;;  %18 = sbr.rel (!%p16_p10) target bundleno = 5 (0x5), region = 77 }
 0x261   :  { %344 = vsyncpa [#allocation3], 1 }
 0x262   :  { %346 = vsyncpa [#allocation3 + $0x1], 1 }
 0x263   :  { %347 = vsyncpa [#allocation4], 1 }
 0x264   :  { %349 = vsyncpa [#allocation4 + $0x1], 1 }

</bundles_post_ra>
